<compile_context>
chip_gen: v7x
topology: tpu7x:2x2x1
jax: 0.10.0
libtpu: 0.0.40
codegen_flags: <defaults>
</compile_context>

<pallas_src>
import functools

import jax
import jax.numpy as jnp
from jax.experimental import pallas as pl
from jax.experimental.pallas import tpu as pltpu


def _round_up(v: int, m: int) -> int:
    return (v + m - 1) // m * m


def _vmem_cap_bytes() -> int:
    """Physical VMEM capacity; conservative 64 MiB fallback (v7x per-core)."""
    try:
        info = pltpu.get_tpu_info()
        cap = getattr(info, "vmem_capacity_bytes", None)
        if cap:
            return int(cap)
    except Exception:
        pass
    return 64 << 20


# --------------------------------------------------------------------------
# Kernels
# --------------------------------------------------------------------------
def ffn_kernel_resident(x_ref, w1_ref, b1_ref, w2_ref, b2_ref, o_ref):
    """Weights fully VMEM-resident; single 'parallel' grid axis over token tiles."""
    h = jnp.dot(x_ref[...], w1_ref[...], preferred_element_type=jnp.float32)
    h = jnp.maximum(h + b1_ref[...], 0.0)                      # (tile_n, d_inner_p)
    y = jnp.dot(h.astype(w2_ref.dtype), w2_ref[...],
                preferred_element_type=jnp.float32)            # (tile_n, d_model_p)
    o_ref[...] = (y + b2_ref[...]).astype(o_ref.dtype)


def ffn_kernel_chunked(x_ref, w1_ref, b1_ref, w2_ref, b2_ref, o_ref, acc_ref):
    """d_inner chunked along an 'arbitrary' reduction axis with f32 accumulator."""
    k = pl.program_id(1)

    @pl.when(k == 0)
    def _():
        acc_ref[...] = jnp.zeros_like(acc_ref)

    h = jnp.dot(x_ref[...], w1_ref[...], preferred_element_type=jnp.float32)
    h = jnp.maximum(h + b1_ref[...], 0.0)                      # (tile_n, tile_k)
    acc_ref[...] += jnp.dot(h.astype(w2_ref.dtype), w2_ref[...],
                            preferred_element_type=jnp.float32)

    @pl.when(k == pl.num_programs(1) - 1)
    def _():
        o_ref[...] = (acc_ref[...] + b2_ref[...]).astype(o_ref.dtype)


# --------------------------------------------------------------------------
# Wrapper
# --------------------------------------------------------------------------
@functools.partial(jax.jit, static_argnames=("tile_n", "tile_k", "force_chunked"))
def ffn_forward(x, w1, b1, w2, b2, *, tile_n=512, tile_k=512, force_chunked=False):
    """x: (batch, seq, d_model). Returns (batch, seq, d_model)."""
    B, T, d_model = x.shape
    d_inner = w1.shape[1]
    N = B * T

    # Lane-aligned feature dims (round to 128, never to tile_k).
    d_model_p = _round_up(d_model, 128)
    d_inner_p = _round_up(d_inner, 128)

    # 128-aligned row tile; don't over-tile tiny problems.
    tile_n = _round_up(max(128, min(tile_n, _round_up(N, 128))), 128)
    n_pad = _round_up(N, tile_n)
    n_tiles = n_pad // tile_n

    eb = jnp.dtype(x.dtype).itemsize      # activation element bytes
    ew = jnp.dtype(w1.dtype).itemsize     # weight element bytes

    # ------------------------------------------------------------------
    # Zero-pad only what actually needs padding (exact: pads contribute 0).
    # ------------------------------------------------------------------
    x2 = x.reshape(N, d_model)
    if n_pad != N or d_model_p != d_model:
        x2 = jnp.pad(x2, ((0, n_pad - N), (0, d_model_p - d_model)))
    if d_model_p != d_model or d_inner_p != d_inner:
        w1p = jnp.pad(w1, ((0, d_model_p - d_model), (0, d_inner_p - d_inner)))
        w2p = jnp.pad(w2, ((0, d_inner_p - d_inner), (0, d_model_p - d_model)))
    else:
        w1p, w2p = w1, w2
    b1p = (jnp.pad(b1, (0, d_inner_p - d_inner)) if d_inner_p != d_inner else b1
           ).reshape(1, d_inner_p)
    b2p = (jnp.pad(b2, (0, d_model_p - d_model)) if d_model_p != d_model else b2
           ).reshape(1, d_model_p)

    # ------------------------------------------------------------------
    # Choose resident-weight path vs. chunked-reduction path.
    # ------------------------------------------------------------------
    vmem_budget = int(0.85 * _vmem_cap_bytes())

    resident_bytes = (
        d_model_p * d_inner_p * ew          # W1 (fetched once, single-buffered)
        + d_inner_p * d_model_p * ew        # W2
        + (d_inner_p + d_model_p) * ew      # biases
        + 2 * tile_n * d_model_p * eb       # x tiles (double-buffered)
        + 2 * tile_n * d_model_p * eb       # out tiles
        + tile_n * d_inner_p * 4            # h intermediate (f32)
        + tile_n * d_model_p * 4            # y intermediate (f32)
    )
    use_resident = (not force_chunked) and (resident_bytes + (4 << 20) <= vmem_budget)

    if use_resident:
        vmem_limit = int(min(resident_bytes * 5 // 4 + (4 << 20), vmem_budget))
        flops = 4 * n_pad * d_model_p * d_inner_p
        bytes_accessed = int(x2.size * eb + w1p.size * ew + w2p.size * ew
                             + b1p.size * ew + b2p.size * ew
                             + n_pad * d_model_p * eb)
        out = pl.pallas_call(
            ffn_kernel_resident,
            out_shape=jax.ShapeDtypeStruct((n_pad, d_model_p), x.dtype),
            grid_spec=pltpu.PrefetchScalarGridSpec(
                num_scalar_prefetch=0,
                grid=(n_tiles,),
                in_specs=[
                    pl.BlockSpec((tile_n, d_model_p),    lambda i: (i, 0)),  # x
                    pl.BlockSpec((d_model_p, d_inner_p), lambda i: (0, 0)),  # W1 (resident)
                    pl.BlockSpec((1, d_inner_p),         lambda i: (0, 0)),  # b1
                    pl.BlockSpec((d_inner_p, d_model_p), lambda i: (0, 0)),  # W2 (resident)
                    pl.BlockSpec((1, d_model_p),         lambda i: (0, 0)),  # b2
                ],
                out_specs=pl.BlockSpec((tile_n, d_model_p), lambda i: (i, 0)),
            ),
            compiler_params=pltpu.CompilerParams(
                dimension_semantics=("parallel",),
                vmem_limit_bytes=vmem_limit,
            ),
            cost_estimate=pl.CostEstimate(flops=flops, transcendentals=0,
                                          bytes_accessed=bytes_accessed),
        )(x2, w1p, b1p, w2p, b2p)
    else:
        # Chunked reduction over d_inner; tile_k divides d_inner_p exactly.
        tile_k = _round_up(max(128, min(tile_k, d_inner_p)), 128)
        while d_inner_p % tile_k != 0:
            tile_k -= 128
        k_chunks = d_inner_p // tile_k

        chunk_bytes = (
            2 * tile_n * d_model_p * eb          # x tiles
            + 2 * d_model_p * tile_k * ew        # W1 tiles
            + 2 * tile_k * d_model_p * ew        # W2 tiles
            + 2 * (tile_k + d_model_p) * ew      # biases
            + 2 * tile_n * d_model_p * eb        # out tiles
            + tile_n * d_model_p * 4             # f32 acc scratch
            + tile_n * tile_k * 4                # h intermediate (f32)
        )
        vmem_limit = int(min(chunk_bytes * 3 // 2 + (4 << 20), vmem_budget))

        flops = 4 * n_pad * d_model_p * d_inner_p
        bytes_accessed = int(x2.size * eb
                             + n_tiles * (w1p.size + w2p.size) * ew   # weight re-reads
                             + b1p.size * ew + b2p.size * ew
                             + n_pad * d_model_p * eb)
        out = pl.pallas_call(
            ffn_kernel_chunked,
            out_shape=jax.ShapeDtypeStruct((n_pad, d_model_p), x.dtype),
            grid_spec=pltpu.PrefetchScalarGridSpec(
                num_scalar_prefetch=0,
                grid=(n_tiles, k_chunks),
                in_specs=[
                    pl.BlockSpec((tile_n, d_model_p), lambda i, k: (i, 0)),   # x
                    pl.BlockSpec((d_model_p, tile_k), lambda i, k: (0, k)),   # W1
                    pl.BlockSpec((1, tile_k),         lambda i, k: (0, k)),   # b1
                    pl.BlockSpec((tile_k, d_model_p), lambda i, k: (k, 0)),   # W2
                    pl.BlockSpec((1, d_model_p),      lambda i, k: (0, 0)),   # b2
                ],
                out_specs=pl.BlockSpec((tile_n, d_model_p), lambda i, k: (i, 0)),
                scratch_shapes=[pltpu.VMEM((tile_n, d_model_p), jnp.float32)],
            ),
            compiler_params=pltpu.CompilerParams(
                dimension_semantics=("parallel", "arbitrary"),
                vmem_limit_bytes=vmem_limit,
            ),
            cost_estimate=pl.CostEstimate(flops=flops, transcendentals=0,
                                          bytes_accessed=bytes_accessed),
        )(x2, w1p, b1p, w2p, b2p)

    return out[:N, :d_model].reshape(B, T, d_model)


def reference_ffn(x, w1, b1, w2, b2):
    h = jnp.maximum(jnp.einsum("btd,df->btf", x, w1) + b1, 0.0)
    return jnp.einsum("btf,fd->btd", h, w2) + b2


if __name__ == "__main__":
    # Small shapes consistent with the module: batch=2, seq=8, d_model=32, d_inner=64
    B, T, d_model, d_inner = 2, 8, 32, 64

    key = jax.random.PRNGKey(0)
    kx, k1, k2, k3, k4 = jax.random.split(key, 5)

    x = jax.random.normal(kx, (B, T, d_model), dtype=jnp.float32)

    # PyTorch Linear stores weight as (out, in); stored here pre-transposed as (in, out).
    w1 = jax.random.normal(k1, (d_model, d_inner), dtype=jnp.float32) * (1.0 / d_model ** 0.5)
    b1 = jax.random.normal(k2, (d_inner,), dtype=jnp.float32) * 0.01
    w2 = jax.random.normal(k3, (d_inner, d_model), dtype=jnp.float32) * (1.0 / d_inner ** 0.5)
    b2 = jax.random.normal(k4, (d_model,), dtype=jnp.float32) * 0.01

    ref = reference_ffn(x, w1, b1, w2, b2)

    # f32, resident-weight fast path
    out = jax.block_until_ready(ffn_forward(x, w1, b1, w2, b2))
    assert out.shape == (B, T, d_model)
    assert jnp.allclose(out, ref, atol=1e-4, rtol=1e-4), "resident path mismatch"

    # f32, forced chunked-reduction path (exercise the fallback kernel too)
    out_c = jax.block_until_ready(ffn_forward(x, w1, b1, w2, b2, force_chunked=True))
    assert jnp.allclose(out_c, ref, atol=1e-4, rtol=1e-4), "chunked path mismatch"

    # bf16 operands -> native fast MXU path (loose tolerance vs f32 reference)
    out_bf = jax.block_until_ready(
        ffn_forward(x.astype(jnp.bfloat16),
                    w1.astype(jnp.bfloat16), b1.astype(jnp.bfloat16),
                    w2.astype(jnp.bfloat16), b2.astype(jnp.bfloat16)))
    assert jnp.allclose(out_bf.astype(jnp.float32), ref, atol=1e-1, rtol=1e-1), \
        "bf16 path mismatch"

    print("KERNEL_OK")
</pallas_src>

<mosaic_0001>
module attributes {stable_mosaic.version = 11 : i64} {
  func.func @ffn_kernel_resident(%arg0: i32, %arg1: memref<128x128xf32, #tpu.memory_space<vmem>>, %arg2: memref<128x128xf32, #tpu.memory_space<vmem>>, %arg3: memref<1x128xf32, #tpu.memory_space<vmem>>, %arg4: memref<128x128xf32, #tpu.memory_space<vmem>>, %arg5: memref<1x128xf32, #tpu.memory_space<vmem>>, %arg6: memref<128x128xf32, #tpu.memory_space<vmem>>) attributes {dimension_semantics = [#tpu.dimension_semantics<parallel>], iteration_bounds = array<i64: 1>, scalar_prefetch = 0 : i64, scratch_operands = 0 : i64, tpu.core_type = #tpu.core_type<tc>, window_params = [{transform_indices = @transform_0, window_bounds = array<i64: 128, 128>}, {pipeline_mode = #tpu.pipeline_mode<synchronous>, transform_indices = @transform_1, window_bounds = array<i64: 128, 128>}, {pipeline_mode = #tpu.pipeline_mode<synchronous>, transform_indices = @transform_2, window_bounds = array<i64: 1, 128>}, {pipeline_mode = #tpu.pipeline_mode<synchronous>, transform_indices = @transform_3, window_bounds = array<i64: 128, 128>}, {pipeline_mode = #tpu.pipeline_mode<synchronous>, transform_indices = @transform_4, window_bounds = array<i64: 1, 128>}, {transform_indices = @transform_5, window_bounds = array<i64: 128, 128>}]} {
    %c0 = arith.constant 0 : index
    %c0_0 = arith.constant 0 : index
    %0 = vector.load %arg1[%c0, %c0_0] : memref<128x128xf32, #tpu.memory_space<vmem>>, vector<128x128xf32>
    %c0_1 = arith.constant 0 : index
    %c0_2 = arith.constant 0 : index
    %1 = vector.load %arg2[%c0_1, %c0_2] : memref<128x128xf32, #tpu.memory_space<vmem>>, vector<128x128xf32>
    %cst = arith.constant dense<0.000000e+00> : vector<128x128xf32>
    %2 = tpu.matmul %0, %1, %cst {dimension_numbers = #tpu.dot_dimension_numbers<[1], [0], [0], [1], [0, 0, 1, 1], [], []>} : vector<128x128xf32>, vector<128x128xf32>, vector<128x128xf32> -> vector<128x128xf32>
    %c0_3 = arith.constant 0 : index
    %c0_4 = arith.constant 0 : index
    %3 = vector.load %arg3[%c0_3, %c0_4] : memref<1x128xf32, #tpu.memory_space<vmem>>, vector<1x128xf32>
    %4 = vector.broadcast %3 : vector<1x128xf32> to vector<128x128xf32>
    %5 = arith.addf %2, %4 : vector<128x128xf32>
    %cst_5 = arith.constant 0.000000e+00 : f32
    %6 = vector.broadcast %cst_5 : f32 to vector<128x128xf32>
    %7 = arith.maximumf %5, %6 : vector<128x128xf32>
    %c0_6 = arith.constant 0 : index
    %c0_7 = arith.constant 0 : index
    %8 = vector.load %arg4[%c0_6, %c0_7] : memref<128x128xf32, #tpu.memory_space<vmem>>, vector<128x128xf32>
    %cst_8 = arith.constant dense<0.000000e+00> : vector<128x128xf32>
    %9 = tpu.matmul %7, %8, %cst_8 {dimension_numbers = #tpu.dot_dimension_numbers<[1], [0], [0], [1], [0, 0, 1, 1], [], []>} : vector<128x128xf32>, vector<128x128xf32>, vector<128x128xf32> -> vector<128x128xf32>
    %c0_9 = arith.constant 0 : index
    %c0_10 = arith.constant 0 : index
    %10 = vector.load %arg5[%c0_9, %c0_10] : memref<1x128xf32, #tpu.memory_space<vmem>>, vector<1x128xf32>
    %11 = vector.broadcast %10 : vector<1x128xf32> to vector<128x128xf32>
    %12 = arith.addf %9, %11 : vector<128x128xf32>
    %c0_11 = arith.constant 0 : index
    %c0_12 = arith.constant 0 : index
    %13 = vector.load %arg6[%c0_11, %c0_12] : memref<128x128xf32, #tpu.memory_space<vmem>>, vector<128x128xf32>
    tpu.vector_store %arg6[%c0_11, %c0_12], %12 {strides = array<i32>} : memref<128x128xf32, #tpu.memory_space<vmem>>, vector<128x128xf32>,
    return
  }
  func.func @transform_0(%arg0: i32) -> (i32, i32) {
    %c0_i32 = arith.constant 0 : i32
    %c0_i32_0 = arith.constant 0 : i32
    return %arg0, %c0_i32 : i32, i32
  }
  func.func @transform_1(%arg0: i32) -> (i32, i32) {
    %c0_i32 = arith.constant 0 : i32
    %c0_i32_0 = arith.constant 0 : i32
    %c0_i32_1 = arith.constant 0 : i32
    return %c0_i32, %c0_i32_0 : i32, i32
  }
  func.func @transform_2(%arg0: i32) -> (i32, i32) {
    %c0_i32 = arith.constant 0 : i32
    %c0_i32_0 = arith.constant 0 : i32
    %c0_i32_1 = arith.constant 0 : i32
    return %c0_i32, %c0_i32_0 : i32, i32
  }
  func.func @transform_3(%arg0: i32) -> (i32, i32) {
    %c0_i32 = arith.constant 0 : i32
    %c0_i32_0 = arith.constant 0 : i32
    %c0_i32_1 = arith.constant 0 : i32
    return %c0_i32, %c0_i32_0 : i32, i32
  }
  func.func @transform_4(%arg0: i32) -> (i32, i32) {
    %c0_i32 = arith.constant 0 : i32
    %c0_i32_0 = arith.constant 0 : i32
    %c0_i32_1 = arith.constant 0 : i32
    return %c0_i32, %c0_i32_0 : i32, i32
  }
  func.func @transform_5(%arg0: i32) -> (i32, i32) {
    %c0_i32 = arith.constant 0 : i32
    %c0_i32_0 = arith.constant 0 : i32
    return %arg0, %c0_i32 : i32, i32
  }
}

</mosaic_0001>

<bundles_post_ra>
// kernel: ffn_forward.1
= control target key start
LH: loop header
LB: loop body
LE: loop exit
PB: predicated region body
PF: predicated region fallthrough
CT: control target
= control target key end

     0   :  { %s878_s1 = inlined_call_operand.vmem [shape: f32[128,128], index: 1, kind: input, shape index: {}]   ;;  %s879_s0 = inlined_call_operand.vmem [shape: f32[128,128], index: 0, kind: input, shape index: {}]   ;;  %s880_s3 = inlined_call_operand.vmem [shape: f32[128,128], index: 3, kind: input, shape index: {}]   ;;  %s881_s2 = inlined_call_operand.vmem [shape: f32[1,128], index: 2, kind: input, shape index: {}]   ;;  %s882_s4 = inlined_call_operand.vmem [shape: f32[1,128], index: 4, kind: input, shape index: {}]   ;;  %s883_s5 = inlined_call_operand.vmem [shape: f32[128,128], index: 5, kind: output, shape index: {}]  }
   0x1   :  { %v36_v0 = vld [vmem:[%s878_s1] sm:$0xff]  ;;  %v37_v1 = vld [vmem:[%s878_s1 + $0x8] sm:$0xff]  ;;  %v38_v2 = vld [vmem:[%s878_s1 + $0x10] sm:$0xff] }
   0x2   :  { %v586_v3 = vpack.c.bf16 %v37_v1, %v36_v0  ;;  %v39_v4 = vld [vmem:[%s878_s1 + $0x18] sm:$0xff]  ;;  %v40_v6 = vld [vmem:[%s878_s1 + $0x20] sm:$0xff]  ;;  %v41_v7 = vld [vmem:[%s878_s1 + $0x28] sm:$0xff] }
   0x3   :  { %v590_v5 = vpack.c.bf16 %v39_v4, %v38_v2  ;;  %v594_v8 = vpack.c.bf16 %v41_v7, %v40_v6  ;;  %v20_v9 = vld [vmem:[%s879_s0] sm:$0xff]  ;;  %v42_v10 = vld [vmem:[%s878_s1 + $0x30] sm:$0xff]  ;;  %v43_v11 = vld [vmem:[%s878_s1 + $0x38] sm:$0xff] }
   0x4   :  { %587 = vmatprep.subr.bf16.mxu0 %v586_v3  ;;  %506 = vmatprep.mubr.f32.mxu0 %v20_v9  ;;  %v598_v12 = vpack.c.bf16 %v43_v11, %v42_v10  ;;  %v44_v13 = vld [vmem:[%s878_s1 + $0x40] sm:$0xff]  ;;  %v45_v14 = vld [vmem:[%s878_s1 + $0x48] sm:$0xff]  ;;  %v222_v17 = vld [vmem:[%s880_s3 + $0x10] sm:$0xff] }
   0x5   :  { %589 = vmatpush3.bf16.msra.mxu0 %v586_v3  ;;  %v220_v15 = vld [vmem:[%s880_s3] sm:$0xff]  ;;  %v221_v16 = vld [vmem:[%s880_s3 + $0x8] sm:$0xff]  ;;  %v223_v18 = vld [vmem:[%s880_s3 + $0x18] sm:$0xff]  ;;  %v602_v21 = vpack.c.bf16 %v45_v14, %v44_v13 }
   0x6   :  { %591 = vmatprep.subr.bf16.mxu0 %v590_v5  ;;  %v618_v19 = vpack.c.bf16 %v221_v16, %v220_v15  ;;  %v622_v20 = vpack.c.bf16 %v223_v18, %v222_v17  ;;  %v224_v22 = vld [vmem:[%s880_s3 + $0x20] sm:$0xff]  ;;  %v225_v23 = vld [vmem:[%s880_s3 + $0x28] sm:$0xff]  ;;  %v46_v24 = vld [vmem:[%s878_s1 + $0x50] sm:$0xff] }
   0x7   :  { %v47_v25 = vld [vmem:[%s878_s1 + $0x58] sm:$0xff]  ;;  %v626_v26 = vpack.c.bf16 %v225_v23, %v224_v22  ;;  %v226_v28 = vld [vmem:[%s880_s3 + $0x30] sm:$0xff]  ;;  %v48_v30 = vld [vmem:[%s878_s1 + $0x60] sm:$0xff] }
   0x8   :  { %619 = vmatprep.subr.bf16.mxu1 %v618_v19  ;;  %v606_v27 = vpack.c.bf16 %v47_v25, %v46_v24  ;;  %v227_v29 = vld [vmem:[%s880_s3 + $0x38] sm:$0xff]  ;;  %v49_v31 = vld [vmem:[%s878_s1 + $0x68] sm:$0xff]  ;;  %v228_v34 = vld [vmem:[%s880_s3 + $0x40] sm:$0xff] }
   0x9   :  { %593 = vmatpush3.bf16.msra.mxu0 %v590_v5  ;;  %621 = vmatpush3.bf16.msra.mxu1 %v618_v19  ;;  %v630_v32 = vpack.c.bf16 %v227_v29, %v226_v28  ;;  %v610_v33 = vpack.c.bf16 %v49_v31, %v48_v30  ;;  %v229_v35 = vld [vmem:[%s880_s3 + $0x48] sm:$0xff]  ;;  %v50_v36 = vld [vmem:[%s878_s1 + $0x70] sm:$0xff]  ;;  %v51_v37 = vld [vmem:[%s878_s1 + $0x78] sm:$0xff] }
   0xa   :  { %595 = vmatprep.subr.bf16.mxu0 %v594_v8  ;;  %623 = vmatprep.subr.bf16.mxu1 %v622_v20  ;;  %v634_v38 = vpack.c.bf16 %v229_v35, %v228_v34  ;;  %v614_v39 = vpack.c.bf16 %v51_v37, %v50_v36  ;;  %v230_v40 = vld [vmem:[%s880_s3 + $0x50] sm:$0xff]  ;;  %v231_v41 = vld [vmem:[%s880_s3 + $0x58] sm:$0xff]  ;;  %v232_v43 = vld [vmem:[%s880_s3 + $0x60] sm:$0xff] }
   0xb   :  { %v638_v42 = vpack.c.bf16 %v231_v41, %v230_v40  ;;  %v233_v44 = vld [vmem:[%s880_s3 + $0x68] sm:$0xff]  ;;  %v22_v47 = vld [vmem:[%s879_s0 + $0x10] sm:$0xff]  ;;  %v23_v48 = vld [vmem:[%s879_s0 + $0x18] sm:$0xff] }
   0xc   :  { %v21_v45 = vld [vmem:[%s879_s0 + $0x8] sm:$0xff]  ;;  %v642_v46 = vpack.c.bf16 %v233_v44, %v232_v43  ;;  %v24_v49 = vld [vmem:[%s879_s0 + $0x20] sm:$0xff]  ;;  %v26_v51 = vld [vmem:[%s879_s0 + $0x30] sm:$0xff] }
   0xd   :  { %597 = vmatpush3.bf16.msra.mxu0 %v594_v8  ;;  %625 = vmatpush3.bf16.msra.mxu1 %v622_v20  ;;  %v25_v50 = vld [vmem:[%s879_s0 + $0x28] sm:$0xff]  ;;  %v27_v52 = vld [vmem:[%s879_s0 + $0x38] sm:$0xff]  ;;  %v28_v53 = vld [vmem:[%s879_s0 + $0x40] sm:$0xff] }
   0xe   :  { %599 = vmatprep.subr.bf16.mxu0 %v598_v12  ;;  %627 = vmatprep.subr.bf16.mxu1 %v626_v26  ;;  %v29_v54 = vld [vmem:[%s879_s0 + $0x48] sm:$0xff]  ;;  %v30_v55 = vld [vmem:[%s879_s0 + $0x50] sm:$0xff]  ;;  %v31_v56 = vld [vmem:[%s879_s0 + $0x58] sm:$0xff] }
   0xf   :  { %v32_v57 = vld [vmem:[%s879_s0 + $0x60] sm:$0xff]  ;;  %v33_v58 = vld [vmem:[%s879_s0 + $0x68] sm:$0xff]  ;;  %v34_v59 = vld [vmem:[%s879_s0 + $0x70] sm:$0xff] }
  0x10   :  { %v35_v60 = vld [vmem:[%s879_s0 + $0x78] sm:$0xff]  ;;  %v234_v61 = vld [vmem:[%s880_s3 + $0x70] sm:$0xff]  ;;  %v408_v0 = vld [vmem:[%s881_s2] ss:$0 sm:$0xff] }
  0x11   :  { %601 = vmatpush3.bf16.msra.mxu0 %v598_v12  ;;  %629 = vmatpush3.bf16.msra.mxu1 %v626_v26  ;;  %v235_v62 = vld [vmem:[%s880_s3 + $0x78] sm:$0xff] }
  0x12   :  { %603 = vmatprep.subr.bf16.mxu0 %v602_v21  ;;  %631 = vmatprep.subr.bf16.mxu1 %v630_v32  ;;  %v646_v63 = vpack.c.bf16 %v235_v62, %v234_v61 }
  0x15   :  { %605 = vmatpush3.bf16.msra.mxu0 %v602_v21  ;;  %633 = vmatpush3.bf16.msra.mxu1 %v630_v32 }
  0x16   :  { %607 = vmatprep.subr.bf16.mxu0 %v606_v27  ;;  %635 = vmatprep.subr.bf16.mxu1 %v634_v38 }
  0x19   :  { %609 = vmatpush3.bf16.msra.mxu0 %v606_v27  ;;  %637 = vmatpush3.bf16.msra.mxu1 %v634_v38 }
  0x1a   :  { %611 = vmatprep.subr.bf16.mxu0 %v610_v33  ;;  %639 = vmatprep.subr.bf16.mxu1 %v638_v42 }
  0x1d   :  { %613 = vmatpush3.bf16.msra.mxu0 %v610_v33  ;;  %641 = vmatpush3.bf16.msra.mxu1 %v638_v42 }
  0x1e   :  { %615 = vmatprep.subr.bf16.mxu0 %v614_v39  ;;  %643 = vmatprep.subr.bf16.mxu1 %v642_v46 }
  0x21   :  { %617 = vmatpush3.bf16.msra.mxu0 %v614_v39  ;;  %645 = vmatpush3.bf16.msra.mxu1 %v642_v46 }
  0x22   :  { %647 = vmatprep.subr.bf16.mxu1 %v646_v63 }
  0x24   :  { %507 = vmatmul.mubr.f32.vlgmr.msra.gmra.mrb[0].mxu0 %v21_v45 }
  0x25   :  { %509 = vmatprep.mubr.f32.mxu0 %v22_v47  ;;  %649 = vmatpush3.bf16.msra.mxu1 %v646_v63 }
  0x28   :  { %510 = vmatmul.mubr.f32.gmra.mrb[2].mxu0 %v23_v48 }
  0x29   :  { %512 = vmatprep.mubr.f32.mxu0 %v24_v49  ;;  %v409_v49 = vld [vmem:[%s882_s4] ss:$0 sm:$0xff] }
  0x2c   :  { %513 = vmatmul.mubr.f32.gmra.mrb[4].mxu0 %v25_v50 }
  0x2d   :  { %515 = vmatprep.mubr.f32.mxu0 %v26_v51 }
  0x30   :  { %516 = vmatmul.mubr.f32.gmra.mrb[6].mxu0 %v27_v52 }
  0x31   :  { %518 = vmatprep.mubr.f32.mxu0 %v28_v53 }
  0x34   :  { %519 = vmatmul.mubr.f32.gmra.mrb[8].mxu0 %v29_v54 }
  0x35   :  { %521 = vmatprep.mubr.f32.mxu0 %v30_v55 }
  0x38   :  { %522 = vmatmul.mubr.f32.gmra.mrb[10].mxu0 %v31_v56 }
  0x39   :  { %524 = vmatprep.mubr.f32.mxu0 %v32_v57 }
  0x3c   :  { %525 = vmatmul.mubr.f32.gmra.mrb[12].mxu0 %v33_v58 }
  0x3d   :  { %527 = vmatprep.mubr.f32.mxu0 %v34_v59 }
  0x40   :  { %528 = vmatmul.mubr.f32.gmra.mrb[14].mxu0 %v35_v60 }
  0xf7   :  { %v508_v1 = vpop.f32.mrb[0].mxu0 }
  0xf8   :  { %v131_v2 = vadd.f32 %v508_v1, %v408_v0  ;;  %v125_v3 = vpop.f32.mrb[1].mxu0 }
  0xf9   :  { %v126_v4 = vadd.f32 %v408_v0, %v125_v3 }
  0xfa   :  { %v205_v7 = vmax.f32 %v131_v2, 0.0 }
  0xfb   :  { %v511_v5 = vpop.f32.mrb[2].mxu0  ;;  %v204_v6 = vmax.f32 %v126_v4, 0.0 }
  0xfc   :  { %v141_v8 = vadd.f32 %v511_v5, %v408_v0  ;;  %v135_v9 = vpop.f32.mrb[3].mxu0 }
  0xfd   :  { %v136_v10 = vadd.f32 %v408_v0, %v135_v9  ;;  %562 = vmatprep.mubr.f32.mxu1 %v204_v6 }
  0xfe   :  { %563 = vmatmul.mubr.f32.vlgmr.msra.gmra.mrb[0].mxu1 %v205_v7  ;;  %v207_v13 = vmax.f32 %v141_v8, 0.0 }
  0xff   :  { %v206_v11 = vmax.f32 %v136_v10, 0.0  ;;  %v514_v12 = vpop.f32.mrb[4].mxu0 }
 0x100   :  { %v151_v14 = vadd.f32 %v514_v12, %v408_v0  ;;  %v145_v15 = vpop.f32.mrb[5].mxu0 }
 0x101   :  { %v146_v16 = vadd.f32 %v408_v0, %v145_v15  ;;  %565 = vmatprep.mubr.f32.mxu1 %v206_v11 }
 0x102   :  { %566 = vmatmul.mubr.f32.gmra.mrb[2].mxu1 %v207_v13  ;;  %v209_v19 = vmax.f32 %v151_v14, 0.0 }
 0x103   :  { %v208_v17 = vmax.f32 %v146_v16, 0.0  ;;  %v517_v18 = vpop.f32.mrb[6].mxu0 }
 0x104   :  { %v161_v20 = vadd.f32 %v517_v18, %v408_v0  ;;  %v155_v21 = vpop.f32.mrb[7].mxu0 }
 0x105   :  { %v156_v22 = vadd.f32 %v408_v0, %v155_v21  ;;  %568 = vmatprep.mubr.f32.mxu1 %v208_v17 }
 0x106   :  { %569 = vmatmul.mubr.f32.gmra.mrb[4].mxu1 %v209_v19  ;;  %v211_v25 = vmax.f32 %v161_v20, 0.0 }
 0x107   :  { %v210_v23 = vmax.f32 %v156_v22, 0.0  ;;  %v520_v24 = vpop.f32.mrb[8].mxu0 }
 0x108   :  { %v171_v26 = vadd.f32 %v520_v24, %v408_v0  ;;  %v165_v27 = vpop.f32.mrb[9].mxu0 }
 0x109   :  { %v166_v28 = vadd.f32 %v408_v0, %v165_v27  ;;  %571 = vmatprep.mubr.f32.mxu1 %v210_v23 }
 0x10a   :  { %572 = vmatmul.mubr.f32.gmra.mrb[6].mxu1 %v211_v25  ;;  %v213_v31 = vmax.f32 %v171_v26, 0.0 }
 0x10b   :  { %v212_v29 = vmax.f32 %v166_v28, 0.0  ;;  %v523_v30 = vpop.f32.mrb[10].mxu0 }
 0x10c   :  { %v181_v32 = vadd.f32 %v523_v30, %v408_v0  ;;  %v175_v33 = vpop.f32.mrb[11].mxu0 }
 0x10d   :  { %v176_v34 = vadd.f32 %v408_v0, %v175_v33  ;;  %574 = vmatprep.mubr.f32.mxu1 %v212_v29 }
 0x10e   :  { %575 = vmatmul.mubr.f32.gmra.mrb[8].mxu1 %v213_v31  ;;  %v215_v37 = vmax.f32 %v181_v32, 0.0 }
 0x10f   :  { %v214_v35 = vmax.f32 %v176_v34, 0.0  ;;  %v526_v36 = vpop.f32.mrb[12].mxu0 }
 0x110   :  { %v191_v38 = vadd.f32 %v526_v36, %v408_v0  ;;  %v185_v39 = vpop.f32.mrb[13].mxu0 }
 0x111   :  { %v186_v40 = vadd.f32 %v408_v0, %v185_v39  ;;  %577 = vmatprep.mubr.f32.mxu1 %v214_v35 }
 0x112   :  { %578 = vmatmul.mubr.f32.gmra.mrb[10].mxu1 %v215_v37  ;;  %v217_v43 = vmax.f32 %v191_v38, 0.0 }
 0x113   :  { %v216_v41 = vmax.f32 %v186_v40, 0.0  ;;  %v529_v42 = vpop.f32.mrb[14].mxu0 }
 0x114   :  { %v201_v44 = vadd.f32 %v529_v42, %v408_v0  ;;  %v195_v45 = vpop.f32.mrb[15].mxu0 }
 0x115   :  { %v196_v46 = vadd.f32 %v408_v0, %v195_v45  ;;  %580 = vmatprep.mubr.f32.mxu1 %v216_v41 }
 0x116   :  { %581 = vmatmul.mubr.f32.gmra.mrb[12].mxu1 %v217_v43  ;;  %v219_v48 = vmax.f32 %v201_v44, 0.0 }
 0x117   :  { %v218_v47 = vmax.f32 %v196_v46, 0.0 }
 0x119   :  { %583 = vmatprep.mubr.f32.mxu1 %v218_v47 }
 0x11a   :  { %584 = vmatmul.mubr.f32.gmra.mrb[14].mxu1 %v219_v48 }
 0x1d1   :  { %v564_v50 = vpop.f32.mrb[0].mxu1 }
 0x1d2   :  { %v315_v51 = vadd.f32 %v564_v50, %v409_v49  ;;  %v309_v52 = vpop.f32.mrb[1].mxu1 }
 0x1d3   :  { %v310_v53 = vadd.f32 %v409_v49, %v309_v52 }
 0x1d4   :  { %389 = vst [vmem:[%s883_s5 + $0x8] sm:$0xff] %v315_v51 }
 0x1d5   :  { %388 = vst [vmem:[%s883_s5] sm:$0xff] %v310_v53  ;;  %v567_v54 = vpop.f32.mrb[2].mxu1 }
 0x1d6   :  { %v325_v55 = vadd.f32 %v567_v54, %v409_v49  ;;  %v319_v56 = vpop.f32.mrb[3].mxu1 }
 0x1d7   :  { %v320_v57 = vadd.f32 %v409_v49, %v319_v56 }
 0x1d8   :  { %391 = vst [vmem:[%s883_s5 + $0x18] sm:$0xff] %v325_v55 }
 0x1d9   :  { %390 = vst [vmem:[%s883_s5 + $0x10] sm:$0xff] %v320_v57  ;;  %v570_v58 = vpop.f32.mrb[4].mxu1 }
 0x1da   :  { %v335_v59 = vadd.f32 %v570_v58, %v409_v49  ;;  %v329_v60 = vpop.f32.mrb[5].mxu1 }
 0x1db   :  { %v330_v61 = vadd.f32 %v409_v49, %v329_v60 }
 0x1dc   :  { %393 = vst [vmem:[%s883_s5 + $0x28] sm:$0xff] %v335_v59 }
 0x1dd   :  { %392 = vst [vmem:[%s883_s5 + $0x20] sm:$0xff] %v330_v61  ;;  %v573_v62 = vpop.f32.mrb[6].mxu1 }
 0x1de   :  { %v345_v63 = vadd.f32 %v573_v62, %v409_v49  ;;  %v339_v0 = vpop.f32.mrb[7].mxu1 }
 0x1df   :  { %v340_v1 = vadd.f32 %v409_v49, %v339_v0 }
 0x1e0   :  { %395 = vst [vmem:[%s883_s5 + $0x38] sm:$0xff] %v345_v63 }
 0x1e1   :  { %394 = vst [vmem:[%s883_s5 + $0x30] sm:$0xff] %v340_v1  ;;  %v576_v2 = vpop.f32.mrb[8].mxu1 }
 0x1e2   :  { %v355_v3 = vadd.f32 %v576_v2, %v409_v49  ;;  %v349_v4 = vpop.f32.mrb[9].mxu1 }
 0x1e3   :  { %v350_v5 = vadd.f32 %v409_v49, %v349_v4 }
 0x1e4   :  { %397 = vst [vmem:[%s883_s5 + $0x48] sm:$0xff] %v355_v3 }
 0x1e5   :  { %396 = vst [vmem:[%s883_s5 + $0x40] sm:$0xff] %v350_v5  ;;  %v579_v6 = vpop.f32.mrb[10].mxu1 }
 0x1e6   :  { %v365_v7 = vadd.f32 %v579_v6, %v409_v49  ;;  %v359_v8 = vpop.f32.mrb[11].mxu1 }
 0x1e7   :  { %v360_v9 = vadd.f32 %v409_v49, %v359_v8 }
 0x1e8   :  { %399 = vst [vmem:[%s883_s5 + $0x58] sm:$0xff] %v365_v7 }
 0x1e9   :  { %398 = vst [vmem:[%s883_s5 + $0x50] sm:$0xff] %v360_v9  ;;  %v582_v10 = vpop.f32.mrb[12].mxu1 }
 0x1ea   :  { %v375_v11 = vadd.f32 %v582_v10, %v409_v49  ;;  %v369_v12 = vpop.f32.mrb[13].mxu1 }
 0x1eb   :  { %v370_v13 = vadd.f32 %v409_v49, %v369_v12 }
 0x1ec   :  { %401 = vst [vmem:[%s883_s5 + $0x68] sm:$0xff] %v375_v11 }
 0x1ed   :  { %400 = vst [vmem:[%s883_s5 + $0x60] sm:$0xff] %v370_v13  ;;  %v585_v14 = vpop.f32.mrb[14].mxu1 }
 0x1ee   :  { %v385_v15 = vadd.f32 %v585_v14, %v409_v49  ;;  %v379_v16 = vpop.f32.mrb[15].mxu1 }
 0x1ef   :  { %v380_v17 = vadd.f32 %v409_v49, %v379_v16 }
 0x1f0   :  { %403 = vst [vmem:[%s883_s5 + $0x78] sm:$0xff] %v385_v15 }
 0x1f1   :  { %402 = vst [vmem:[%s883_s5 + $0x70] sm:$0xff] %v380_v17 }

</bundles_post_ra>
